<compile_context>
chip_gen: v5e
topology: v5e:2x2
jax: 0.10.0
libtpu: 0.0.40
codegen_flags: <defaults>
</compile_context>

<pallas_src>
import functools

import jax
import jax.numpy as jnp
from jax import lax
from jax.experimental import pallas as pl
from jax.experimental.pallas import tpu as pltpu

_NEG_LARGE = -1e30  # avoids (-inf) - (-inf) NaNs in the online max update


# ----------------------------- Pallas kernel ------------------------------

def _label_smoothing_kernel(x_ref, t_ref, o_ref,
                            m_sc, s_sc, xt_sc, ts_sc, xs_sc, *,
                            confidence, smoothing, n_rows, n_cols,
                            tm, tc, use_labels, mask_cols, mask_rows):
    """Grid = (row_tiles, class_tiles); class axis innermost (reduction).

    Per row tile, running statistics in VMEM scratch (all (tm, 1) f32):
      m_sc  : running max(x)
      s_sc  : running sum(exp(x - m))
      xt_sc : running sum(x * target)   (label path: x[label])
      ts_sc : running sum(target)       (label path: unused, == 1)
      xs_sc : running sum(x)
    With lse = m + log(s):
      nll    = -(sum(x*t) - lse * sum(t))
      smooth = (C * lse - sum(x)) / C
    """
    i = pl.program_id(0)
    j = pl.program_id(1)
    nj = pl.num_programs(1)

    @pl.when(j == 0)
    def _init():
        m_sc[...] = jnp.full_like(m_sc, _NEG_LARGE)
        s_sc[...] = jnp.zeros_like(s_sc)
        xt_sc[...] = jnp.zeros_like(xt_sc)
        ts_sc[...] = jnp.zeros_like(ts_sc)
        xs_sc[...] = jnp.zeros_like(xs_sc)

    def update(masked):
        x = x_ref[...].astype(jnp.float32)            # x.float() semantics
        need_col = masked or use_labels
        col = None
        if need_col:
            col = j * tc + lax.broadcasted_iota(jnp.int32, (tm, tc), 1)
        if masked:
            colv = col < n_cols
            x_valid = jnp.where(colv, x, _NEG_LARGE)  # select drops OOB garbage
        else:
            x_valid = x

        # Online logsumexp update.
        m_prev = m_sc[...]
        m_new = jnp.maximum(m_prev, jnp.max(x_valid, axis=-1, keepdims=True))
        alpha = jnp.exp(m_prev - m_new)
        p = jnp.exp(x_valid - m_new)                  # OOB cols underflow to 0
        s_sc[...] = alpha * s_sc[...] + jnp.sum(p, axis=-1, keepdims=True)
        m_sc[...] = m_new

        # Running sum(x) over classes.
        if masked:
            xs_sc[...] += jnp.sum(jnp.where(colv, x, 0.0), axis=-1, keepdims=True)
        else:
            xs_sc[...] += jnp.sum(x, axis=-1, keepdims=True)

        if use_labels:
            lbl = t_ref[...]                          # (tm, 1) int32
            hit = col == lbl                          # valid labels never hit OOB cols
            xt_sc[...] += jnp.sum(jnp.where(hit, x, 0.0), axis=-1, keepdims=True)
        else:
            t = t_ref[...].astype(jnp.float32)        # target.float() semantics
            if masked:
                xt_sc[...] += jnp.sum(jnp.where(colv, x * t, 0.0), axis=-1,
                                      keepdims=True)
                ts_sc[...] += jnp.sum(jnp.where(colv, t, 0.0), axis=-1,
                                      keepdims=True)
            else:
                xt_sc[...] += jnp.sum(x * t, axis=-1, keepdims=True)
                ts_sc[...] += jnp.sum(t, axis=-1, keepdims=True)

    if mask_cols:
        @pl.when(j < nj - 1)
        def _interior():
            update(False)

        @pl.when(j == nj - 1)
        def _edge():
            update(True)
    else:
        update(False)

    @pl.when(j == nj - 1)
    def _finalize():
        lse = m_sc[...] + jnp.log(s_sc[...])                     # (tm, 1)
        if use_labels:
            nll = lse - xt_sc[...]                               # sum(t) == 1
        else:
            nll = -(xt_sc[...] - lse * ts_sc[...])
        smooth = (n_cols * lse - xs_sc[...]) * (1.0 / n_cols)
        per_row = confidence * nll + smoothing * smooth          # (tm, 1)
        if mask_rows:
            row = i * tm + lax.broadcasted_iota(jnp.int32, (tm, 1), 0)
            per_row = jnp.where(row < n_rows, per_row, 0.0)
        tile_sum = jnp.sum(per_row)
        # Per-row-tile partial sum, broadcast over a lane-dense (1, 8, 128) block.
        o_ref[...] = jnp.broadcast_to(tile_sum, o_ref.shape).astype(jnp.float32)


# ------------------------------- wrappers ----------------------------------

def _sublane_packing(dtype):
    return max(8, 32 // jnp.dtype(dtype).itemsize)


def label_smoothing_loss(x, target, smoothing=0.1, *,
                         block_rows=256, block_cols=2048, interpret=False):
    """LabelSmoothing loss -> scalar f32.

    `target` may be dense class probabilities (N, C) (training branch) or
    integer class labels (N,) (eval / cross-entropy fast path).
    """
    x = jnp.asarray(x)
    target = jnp.asarray(target)
    use_labels = bool(jnp.issubdtype(target.dtype, jnp.integer))

    c = x.shape[-1]
    x = x.reshape(-1, c)
    if use_labels:
        target = target.reshape(-1, 1).astype(jnp.int32)
        assert target.shape[0] == x.shape[0]
    else:
        target = target.reshape(-1, c)
        assert target.shape == x.shape

    n = x.shape[0]
    confidence = 1.0 - float(smoothing)

    packing = _sublane_packing(x.dtype)
    if not use_labels:
        packing = max(packing, _sublane_packing(target.dtype))

    # Row tile: full dim if it fits one tile, else a packing-aligned tile.
    if n <= block_rows:
        tm = n
    else:
        tm = max(packing, (int(block_rows) // packing) * packing)
    # Class tile (lane dim): full dim if it fits, else a 128-aligned tile.
    if c <= block_cols:
        tc = c
    else:
        tc = max(128, (int(block_cols) // 128) * 128)

    grid = (pl.cdiv(n, tm), pl.cdiv(c, tc))
    mask_rows = (n % tm) != 0
    mask_cols = (c % tc) != 0

    kernel = functools.partial(
        _label_smoothing_kernel,
        confidence=confidence, smoothing=float(smoothing),
        n_rows=n, n_cols=c, tm=tm, tc=tc,
        use_labels=use_labels, mask_cols=mask_cols, mask_rows=mask_rows)

    x_spec = pl.BlockSpec((tm, tc), lambda i, j: (i, j))
    if use_labels:
        t_spec = pl.BlockSpec((tm, 1), lambda i, j: (i, 0))
        t_bytes = n * 4
    else:
        t_spec = pl.BlockSpec((tm, tc), lambda i, j: (i, j))
        t_bytes = n * c * jnp.dtype(target.dtype).itemsize

    out_bytes = grid[0] * 8 * 128 * 4
    cost = pl.CostEstimate(
        flops=int(8 * n * c),
        transcendentals=int(n * c),
        bytes_accessed=int(n * c * jnp.dtype(x.dtype).itemsize + t_bytes + out_bytes))

    out = pl.pallas_call(
        kernel,
        out_shape=jax.ShapeDtypeStruct((grid[0], 8, 128), jnp.float32),
        grid_spec=pltpu.PrefetchScalarGridSpec(
            num_scalar_prefetch=0,
            grid=grid,
            in_specs=[x_spec, t_spec],
            out_specs=pl.BlockSpec((1, 8, 128), lambda i, j: (i, 0, 0)),
            scratch_shapes=[pltpu.VMEM((tm, 1), jnp.float32)] * 5,
        ),
        compiler_params=pltpu.CompilerParams(
            # Row tiles independent (megacore on v7x); class axis is the reduction.
            dimension_semantics=("parallel", "arbitrary")),
        cost_estimate=cost,
        interpret=interpret,
    )(x, target)

    # Tiny final reduction over per-row-tile partial sums; mean over batch.
    return out[:, 0, 0].sum() * (1.0 / n)


def label_smoothing_forward(x, target, smoothing=0.1, training=True):
    """Full module semantics (self.training handled as a Python bool)."""
    if training:
        return label_smoothing_loss(x, target, smoothing)
    # Eval branch: F.cross_entropy(x, target), mean reduction.  Integer targets
    # take the label fast path (no one-hot materialization).
    # TODO(synk): ignore_index / class weights of F.cross_entropy not supported.
    return label_smoothing_loss(x, target, smoothing=0.0)


# --------------------------- pure-JAX reference -----------------------------

def _reference_loss(x, target, smoothing):
    x = jnp.asarray(x, jnp.float32)
    target = jnp.asarray(target, jnp.float32)
    logprobs = jax.nn.log_softmax(x, axis=-1)
    nll = -(logprobs * target).sum(-1)
    smooth = -logprobs.mean(-1)
    return ((1.0 - smoothing) * nll + smoothing * smooth).mean()


# --------------------------------- main -------------------------------------

if __name__ == "__main__":
    key = jax.random.PRNGKey(0)
    k1, k2, k3, k4 = jax.random.split(key, 4)
    smoothing = 0.1

    # Case 1: small single-tile problem, smoothed one-hot float targets (training).
    B1, C1 = 8, 40
    x1 = jax.random.normal(k1, (B1, C1), jnp.float32) * 3.0
    labels1 = jax.random.randint(k2, (B1,), 0, C1)
    t1 = jax.nn.one_hot(labels1, C1) * (1.0 - smoothing) + smoothing / C1
    loss1 = label_smoothing_forward(x1, t1, smoothing, training=True)
    ref1 = _reference_loss(x1, t1, smoothing)

    # Case 2: bf16 logits, dense bf16 targets, 3x3 grid with row+col edge masks
    # (no wrapper-side padding).
    B2, C2 = 37, 300
    x2 = (jax.random.normal(k3, (B2, C2), jnp.float32) * 2.0).astype(jnp.bfloat16)
    labels2 = jax.random.randint(k4, (B2,), 0, C2)
    t2 = jax.nn.one_hot(labels2, C2, dtype=jnp.bfloat16)
    loss2 = label_smoothing_loss(x2, t2, smoothing, block_rows=16, block_cols=128)
    ref2 = _reference_loss(x2, t2, smoothing)

    # Case 3: eval branch (plain cross-entropy with integer labels -> fast path).
    loss3 = label_smoothing_forward(x1, labels1, smoothing, training=False)
    ref3 = _reference_loss(x1, jax.nn.one_hot(labels1, C1), 0.0)

    # Case 4: label fast path with smoothing, multi-tile grid with edge masks.
    loss4 = label_smoothing_loss(x2, labels2, smoothing,
                                 block_rows=16, block_cols=128)
    ref4 = _reference_loss(x2, jax.nn.one_hot(labels2, C2), smoothing)

    jax.block_until_ready((loss1, loss2, loss3, loss4))
    assert jnp.allclose(loss1, ref1, atol=1e-5, rtol=1e-5), (loss1, ref1)
    assert jnp.allclose(loss2, ref2, atol=2e-3, rtol=2e-3), (loss2, ref2)
    assert jnp.allclose(loss3, ref3, atol=1e-5, rtol=1e-5), (loss3, ref3)
    assert jnp.allclose(loss4, ref4, atol=2e-3, rtol=2e-3), (loss4, ref4)
    print("KERNEL_OK")
</pallas_src>

<mosaic_0001>
module attributes {stable_mosaic.version = 11 : i64} {
  func.func @_label_smoothing_kernel(%arg0: i32, %arg1: i32, %arg2: memref<8x40xf32, #tpu.memory_space<vmem>>, %arg3: memref<8x40xf32, #tpu.memory_space<vmem>>, %arg4: memref<1x8x128xf32, #tpu.memory_space<vmem>>, %arg5: memref<8x1xf32, #tpu.memory_space<vmem>>, %arg6: memref<8x1xf32, #tpu.memory_space<vmem>>, %arg7: memref<8x1xf32, #tpu.memory_space<vmem>>, %arg8: memref<8x1xf32, #tpu.memory_space<vmem>>, %arg9: memref<8x1xf32, #tpu.memory_space<vmem>>) attributes {dimension_semantics = [#tpu.dimension_semantics<parallel>, #tpu.dimension_semantics<arbitrary>], iteration_bounds = array<i64: 1, 1>, scalar_prefetch = 0 : i64, scratch_operands = 5 : i64, tpu.core_type = #tpu.core_type<tc>, window_params = [{transform_indices = @transform_0, window_bounds = array<i64: 8, 40>}, {transform_indices = @transform_1, window_bounds = array<i64: 8, 40>}, {transform_indices = @transform_2, window_bounds = array<i64: 1, 8, 128>}]} {
    %c0_i32 = arith.constant 0 : i32
    %0 = arith.cmpi eq, %arg1, %c0_i32 : i32
    %1 = arith.extui %0 : i1 to i32
    %c0_i32_0 = arith.constant 0 : i32
    %2 = arith.cmpi ne, %1, %c0_i32_0 : i32
    scf.if %2 {
      %cst_30 = arith.constant -1.000000e+30 : f32
      %40 = vector.broadcast %cst_30 : f32 to vector<8x1xf32>
      %c0_31 = arith.constant 0 : index
      %c0_32 = arith.constant 0 : index
      %41 = vector.load %arg5[%c0_31, %c0_32] : memref<8x1xf32, #tpu.memory_space<vmem>>, vector<8x1xf32>
      tpu.vector_store %arg5[%c0_31, %c0_32], %40 {strides = array<i32>} : memref<8x1xf32, #tpu.memory_space<vmem>>, vector<8x1xf32>,
      %cst_33 = arith.constant 0.000000e+00 : f32
      %42 = vector.broadcast %cst_33 : f32 to vector<8x1xf32>
      %c0_34 = arith.constant 0 : index
      %c0_35 = arith.constant 0 : index
      %43 = vector.load %arg6[%c0_34, %c0_35] : memref<8x1xf32, #tpu.memory_space<vmem>>, vector<8x1xf32>
      tpu.vector_store %arg6[%c0_34, %c0_35], %42 {strides = array<i32>} : memref<8x1xf32, #tpu.memory_space<vmem>>, vector<8x1xf32>,
      %cst_36 = arith.constant 0.000000e+00 : f32
      %44 = vector.broadcast %cst_36 : f32 to vector<8x1xf32>
      %c0_37 = arith.constant 0 : index
      %c0_38 = arith.constant 0 : index
      %45 = vector.load %arg7[%c0_37, %c0_38] : memref<8x1xf32, #tpu.memory_space<vmem>>, vector<8x1xf32>
      tpu.vector_store %arg7[%c0_37, %c0_38], %44 {strides = array<i32>} : memref<8x1xf32, #tpu.memory_space<vmem>>, vector<8x1xf32>,
      %cst_39 = arith.constant 0.000000e+00 : f32
      %46 = vector.broadcast %cst_39 : f32 to vector<8x1xf32>
      %c0_40 = arith.constant 0 : index
      %c0_41 = arith.constant 0 : index
      %47 = vector.load %arg8[%c0_40, %c0_41] : memref<8x1xf32, #tpu.memory_space<vmem>>, vector<8x1xf32>
      tpu.vector_store %arg8[%c0_40, %c0_41], %46 {strides = array<i32>} : memref<8x1xf32, #tpu.memory_space<vmem>>, vector<8x1xf32>,
      %cst_42 = arith.constant 0.000000e+00 : f32
      %48 = vector.broadcast %cst_42 : f32 to vector<8x1xf32>
      %c0_43 = arith.constant 0 : index
      %c0_44 = arith.constant 0 : index
      %49 = vector.load %arg9[%c0_43, %c0_44] : memref<8x1xf32, #tpu.memory_space<vmem>>, vector<8x1xf32>
      tpu.vector_store %arg9[%c0_43, %c0_44], %48 {strides = array<i32>} : memref<8x1xf32, #tpu.memory_space<vmem>>, vector<8x1xf32>,
    } else {
    }
    %c0 = arith.constant 0 : index
    %c0_1 = arith.constant 0 : index
    %3 = vector.load %arg2[%c0, %c0_1] : memref<8x40xf32, #tpu.memory_space<vmem>>, vector<8x40xf32>
    %c0_2 = arith.constant 0 : index
    %c0_3 = arith.constant 0 : index
    %4 = vector.load %arg5[%c0_2, %c0_3] : memref<8x1xf32, #tpu.memory_space<vmem>>, vector<8x1xf32>
    %cst = arith.constant dense<0xFF800000> : vector<8xf32>
    %5 = vector.multi_reduction <maximumf>, %3, %cst [1] : vector<8x40xf32> to vector<8xf32>
    %6 = vector.shape_cast %5 : vector<8xf32> to vector<8x1xf32>
    %7 = arith.maximumf %4, %6 : vector<8x1xf32>
    %8 = arith.subf %4, %7 : vector<8x1xf32>
    %9 = math.exp %8 : vector<8x1xf32>
    %10 = vector.broadcast %7 : vector<8x1xf32> to vector<8x40xf32>
    %11 = arith.subf %3, %10 : vector<8x40xf32>
    %12 = math.exp %11 : vector<8x40xf32>
    %c0_4 = arith.constant 0 : index
    %c0_5 = arith.constant 0 : index
    %13 = vector.load %arg6[%c0_4, %c0_5] : memref<8x1xf32, #tpu.memory_space<vmem>>, vector<8x1xf32>
    %14 = arith.mulf %9, %13 : vector<8x1xf32>
    %cst_6 = arith.constant dense<0.000000e+00> : vector<8xf32>
    %15 = vector.multi_reduction <add>, %12, %cst_6 [1] : vector<8x40xf32> to vector<8xf32>
    %16 = vector.shape_cast %15 : vector<8xf32> to vector<8x1xf32>
    %17 = arith.addf %14, %16 : vector<8x1xf32>
    %c0_7 = arith.constant 0 : index
    %c0_8 = arith.constant 0 : index
    %18 = vector.load %arg6[%c0_7, %c0_8] : memref<8x1xf32, #tpu.memory_space<vmem>>, vector<8x1xf32>
    tpu.vector_store %arg6[%c0_7, %c0_8], %17 {strides = array<i32>} : memref<8x1xf32, #tpu.memory_space<vmem>>, vector<8x1xf32>,
    %c0_9 = arith.constant 0 : index
    %c0_10 = arith.constant 0 : index
    %19 = vector.load %arg5[%c0_9, %c0_10] : memref<8x1xf32, #tpu.memory_space<vmem>>, vector<8x1xf32>
    tpu.vector_store %arg5[%c0_9, %c0_10], %7 {strides = array<i32>} : memref<8x1xf32, #tpu.memory_space<vmem>>, vector<8x1xf32>,
    %c0_11 = arith.constant 0 : index
    %c0_12 = arith.constant 0 : index
    %20 = vector.load %arg9[%c0_11, %c0_12] : memref<8x1xf32, #tpu.memory_space<vmem>>, vector<8x1xf32>
    %cst_13 = arith.constant dense<0.000000e+00> : vector<8xf32>
    %21 = vector.multi_reduction <add>, %3, %cst_13 [1] : vector<8x40xf32> to vector<8xf32>
    %22 = vector.shape_cast %21 : vector<8xf32> to vector<8x1xf32>
    %23 = arith.addf %20, %22 : vector<8x1xf32>
    %c0_14 = arith.constant 0 : index
    %c0_15 = arith.constant 0 : index
    %24 = vector.load %arg9[%c0_14, %c0_15] : memref<8x1xf32, #tpu.memory_space<vmem>>, vector<8x1xf32>
    tpu.vector_store %arg9[%c0_14, %c0_15], %23 {strides = array<i32>} : memref<8x1xf32, #tpu.memory_space<vmem>>, vector<8x1xf32>,
    %c0_16 = arith.constant 0 : index
    %c0_17 = arith.constant 0 : index
    %25 = vector.load %arg3[%c0_16, %c0_17] : memref<8x40xf32, #tpu.memory_space<vmem>>, vector<8x40xf32>
    %c0_18 = arith.constant 0 : index
    %c0_19 = arith.constant 0 : index
    %26 = vector.load %arg7[%c0_18, %c0_19] : memref<8x1xf32, #tpu.memory_space<vmem>>, vector<8x1xf32>
    %27 = arith.mulf %3, %25 : vector<8x40xf32>
    %cst_20 = arith.constant dense<0.000000e+00> : vector<8xf32>
    %28 = vector.multi_reduction <add>, %27, %cst_20 [1] : vector<8x40xf32> to vector<8xf32>
    %29 = vector.shape_cast %28 : vector<8xf32> to vector<8x1xf32>
    %30 = arith.addf %26, %29 : vector<8x1xf32>
    %c0_21 = arith.constant 0 : index
    %c0_22 = arith.constant 0 : index
    %31 = vector.load %arg7[%c0_21, %c0_22] : memref<8x1xf32, #tpu.memory_space<vmem>>, vector<8x1xf32>
    tpu.vector_store %arg7[%c0_21, %c0_22], %30 {strides = array<i32>} : memref<8x1xf32, #tpu.memory_space<vmem>>, vector<8x1xf32>,
    %c0_23 = arith.constant 0 : index
    %c0_24 = arith.constant 0 : index
    %32 = vector.load %arg8[%c0_23, %c0_24] : memref<8x1xf32, #tpu.memory_space<vmem>>, vector<8x1xf32>
    %cst_25 = arith.constant dense<0.000000e+00> : vector<8xf32>
    %33 = vector.multi_reduction <add>, %25, %cst_25 [1] : vector<8x40xf32> to vector<8xf32>
    %34 = vector.shape_cast %33 : vector<8xf32> to vector<8x1xf32>
    %35 = arith.addf %32, %34 : vector<8x1xf32>
    %c0_26 = arith.constant 0 : index
    %c0_27 = arith.constant 0 : index
    %36 = vector.load %arg8[%c0_26, %c0_27] : memref<8x1xf32, #tpu.memory_space<vmem>>, vector<8x1xf32>
    tpu.vector_store %arg8[%c0_26, %c0_27], %35 {strides = array<i32>} : memref<8x1xf32, #tpu.memory_space<vmem>>, vector<8x1xf32>,
    %c0_i32_28 = arith.constant 0 : i32
    %37 = arith.cmpi eq, %arg1, %c0_i32_28 : i32
    %38 = arith.extui %37 : i1 to i32
    %c0_i32_29 = arith.constant 0 : i32
    %39 = arith.cmpi ne, %38, %c0_i32_29 : i32
    scf.if %39 {
      %c0_30 = arith.constant 0 : index
      %c0_31 = arith.constant 0 : index
      %40 = vector.load %arg5[%c0_30, %c0_31] : memref<8x1xf32, #tpu.memory_space<vmem>>, vector<8x1xf32>
      %c0_32 = arith.constant 0 : index
      %c0_33 = arith.constant 0 : index
      %41 = vector.load %arg6[%c0_32, %c0_33] : memref<8x1xf32, #tpu.memory_space<vmem>>, vector<8x1xf32>
      %42 = math.log %41 : vector<8x1xf32>
      %43 = arith.addf %40, %42 : vector<8x1xf32>
      %c0_34 = arith.constant 0 : index
      %c0_35 = arith.constant 0 : index
      %44 = vector.load %arg7[%c0_34, %c0_35] : memref<8x1xf32, #tpu.memory_space<vmem>>, vector<8x1xf32>
      %c0_36 = arith.constant 0 : index
      %c0_37 = arith.constant 0 : index
      %45 = vector.load %arg8[%c0_36, %c0_37] : memref<8x1xf32, #tpu.memory_space<vmem>>, vector<8x1xf32>
      %46 = arith.mulf %43, %45 : vector<8x1xf32>
      %47 = arith.subf %44, %46 : vector<8x1xf32>
      %cst_38 = arith.constant 0.000000e+00 : f32
      %48 = vector.broadcast %cst_38 : f32 to vector<8x1xf32>
      %49 = arith.subf %48, %47 : vector<8x1xf32>
      %cst_39 = arith.constant 4.000000e+01 : f32
      %50 = vector.broadcast %cst_39 : f32 to vector<8x1xf32>
      %51 = arith.mulf %50, %43 : vector<8x1xf32>
      %c0_40 = arith.constant 0 : index
      %c0_41 = arith.constant 0 : index
      %52 = vector.load %arg9[%c0_40, %c0_41] : memref<8x1xf32, #tpu.memory_space<vmem>>, vector<8x1xf32>
      %53 = arith.subf %51, %52 : vector<8x1xf32>
      %cst_42 = arith.constant 2.500000e-02 : f32
      %54 = vector.broadcast %cst_42 : f32 to vector<8x1xf32>
      %55 = arith.mulf %53, %54 : vector<8x1xf32>
      %cst_43 = arith.constant 0.899999976 : f32
      %56 = vector.broadcast %cst_43 : f32 to vector<8x1xf32>
      %57 = arith.mulf %56, %49 : vector<8x1xf32>
      %cst_44 = arith.constant 1.000000e-01 : f32
      %58 = vector.broadcast %cst_44 : f32 to vector<8x1xf32>
      %59 = arith.mulf %58, %55 : vector<8x1xf32>
      %60 = arith.addf %57, %59 : vector<8x1xf32>
      %61 = vector.shape_cast %60 : vector<8x1xf32> to vector<1x8x1xf32>
      %cst_45 = arith.constant dense<0.000000e+00> : vector<1xf32>
      %62 = vector.multi_reduction <add>, %61, %cst_45 [1, 2] : vector<1x8x1xf32> to vector<1xf32>
      %63 = vector.shape_cast %62 : vector<1xf32> to vector<1x1x1xf32>
      %64 = vector.extract %63[0, 0, 0] : f32 from vector<1x1x1xf32>
      %65 = vector.broadcast %64 : f32 to vector<1x8x128xf32>
      %c0_46 = arith.constant 0 : index
      %c0_47 = arith.constant 0 : index
      %c0_48 = arith.constant 0 : index
      %66 = vector.load %arg4[%c0_46, %c0_47, %c0_48] : memref<1x8x128xf32, #tpu.memory_space<vmem>>, vector<1x8x128xf32>
      tpu.vector_store %arg4[%c0_46, %c0_47, %c0_48], %65 {strides = array<i32>} : memref<1x8x128xf32, #tpu.memory_space<vmem>>, vector<1x8x128xf32>,
    } else {
    }
    return
  }
  func.func @transform_0(%arg0: i32, %arg1: i32) -> (i32, i32) {
    %c0_i32 = arith.constant 0 : i32
    return %arg0, %arg1 : i32, i32
  }
  func.func @transform_1(%arg0: i32, %arg1: i32) -> (i32, i32) {
    %c0_i32 = arith.constant 0 : i32
    return %arg0, %arg1 : i32, i32
  }
  func.func @transform_2(%arg0: i32, %arg1: i32) -> (i32, i32, i32) {
    %c0_i32 = arith.constant 0 : i32
    %c0_i32_0 = arith.constant 0 : i32
    %c0_i32_1 = arith.constant 0 : i32
    return %arg0, %c0_i32, %c0_i32_0 : i32, i32, i32
  }
}

</mosaic_0001>

<bundles_post_ra>
// kernel: tpu_custom_call.1
= control target key start
LH: loop header
LB: loop body
LE: loop exit
PB: predicated region body
PF: predicated region fallthrough
CT: control target
= control target key end

     0   :  { %7 = vsyncpa [#allocation8], 0  ;;  %s286_s0 = inlined_call_operand.hbm [shape: f32[8,40], index: 0, kind: input, shape index: {}]   ;;  %s287_s1 = inlined_call_operand.hbm [shape: f32[8,40], index: 1, kind: input, shape index: {}]   ;;  %s288_s2 = inlined_call_operand.hbm [shape: f32[1,8,128], index: 2, kind: output, shape index: {}]  }
   0x1   :  { %8 = vsyncpa [#allocation11], 0 }
   0x2   :  { %9 = vsyncpa [#allocation9], 0  ;;  %s15_s11 = sshll.u32 %s286_s0, 4  ;;  %s240_s12 = smov [#allocation7]   ;;  %s16_s11 = int_to_ptr.hbm [resolvable:$true] %s15_s11 }
   0x3   :  { %s17_s13 = sshll.u32 %s240_s12, 4  ;;  %s26_s16 = sshll.u32 %s287_s1, 4  ;;  %s18_s13 = int_to_ptr.vmem [resolvable:$true] %s17_s13  ;;  %s27_s16 = int_to_ptr.hbm [resolvable:$true] %s26_s16 }
   0x4   :  { %20 = dma.hbm_to_vmem [thread:$0]  %s16_s11, 128, %s18_s13, [#allocation8]  }
   0x5   :  { %s241_s17 = smov [#allocation10]  }
   0x6   :  { %s28_s18 = sshll.u32 %s241_s17, 4  ;;  %s29_s18 = int_to_ptr.vmem [resolvable:$true] %s28_s18 }
   0x7   :  { %31 = dma.hbm_to_vmem [thread:$0]  %s27_s16, 128, %s29_s18, [#allocation11]  }
   0x8   :  { %234 = dma.done.wait [#allocation8], 128  }
   0x9   :  { %235 = vsyncadd [#allocation8], 4294967168 }
   0xa   :  { %236 = dma.done.wait [#allocation11], 128  }
   0xb   :  { %237 = vsyncadd [#allocation11], 4294967168  ;;  %vm44_vm0 = vcmask 7168   ;;  %v242_v0 = vmov -1e+30   ;;  %vm52_vm1 = vcmask 326656  }
   0xc   :  { %45 = vst.msk [vmem:[#allocation2] sm:$0xff] %vm44_vm0, %v242_v0  ;;  %v50_v1 = vld [vmem:[#allocation7] sm:$0xff]  ;;  %v243_v3 = vmov 0   ;;  %v244_v4 = vmov 0.0   ;;  %v83_v10 = vld [vmem:[#allocation10] sm:$0xff]  ;;  %s245_s0 = smov [#allocation12]  }
   0xd   :  { %v53_v2 = vsel %vm52_vm1, %v50_v1, -inf  ;;  %155 = vset.pattern.permute.xlu0 %v243_v3  ;;  %46 = vst.msk [vmem:[#allocation3] sm:$0xff] %vm44_vm0, %v244_v4  ;;  %v78_v9 = vsel %vm52_vm1, %v50_v1, 0.0  ;;  %v85_v11 = vmul.f32 %v83_v10, %v50_v1  ;;  %v92_v18 = vsel %vm52_vm1, %v83_v10, 0.0  ;;  %s134_s1 = sshll.u32 %s245_s0, 4  ;;  %s136_s21 = sshll.u32 %s288_s2, 4  ;;  %s135_s1 = int_to_ptr.vmem [resolvable:$true] %s134_s1  ;;  %s137_s21 = int_to_ptr.hbm [resolvable:$true] %s136_s21 }
   0xe   :  { %54 = vmax.xlane.f32.xlu0 %v53_v2  ;;  %47 = vst.msk [vmem:[#allocation4] sm:$0xff] %vm44_vm0, %v244_v4  ;;  %79 = vadd.xlane.f32.xlu2 %v78_v9 }
   0xf   :  { %48 = vst.msk [vmem:[#allocation5] sm:$0xff] %vm44_vm0, %v244_v4  ;;  %v86_v12 = vsel %vm52_vm1, %v85_v11, 0.0 }
  0x10   :  { %49 = vst.msk [vmem:[#allocation6] sm:$0xff] %vm44_vm0, %v244_v4 }
  0x13   :  { %v51_v5 = vld [vmem:[#allocation2] sm:$0xff] }
  0x14   :  { %v68_v27 = vld [vmem:[#allocation3] sm:$0xff] }
  0x15   :  { %v84_v23 = vld [vmem:[#allocation4] sm:$0xff] }
  0x16   :  { %87 = vadd.xlane.f32.xlu2 %v86_v12  ;;  %v91_v31 = vld [vmem:[#allocation5] sm:$0xff] }
  0x17   :  { %v77_v20 = vld [vmem:[#allocation6] sm:$0xff] }
  0x81   :  { %v55_v6 = vpop.xlane.xlu0 %54  ;;  %v80_v19 = vpop.xlane.xlu2 %79 }
  0x82   :  { %v56_v7 = vmax.f32 %v51_v5, %v55_v6  ;;  %v81_v21 = vadd.f32 %v80_v19, %v77_v20 }
  0x84   :  { %v57_v8 = vsub.f32 %v51_v5, %v56_v7  ;;  %76 = vst.msk [vmem:[#allocation2] sm:$0xff] %vm44_vm0, %v56_v7  ;;  %62 = vperm.xlu0 %155, %v56_v7  }
  0x85   :  { %82 = vst.msk [vmem:[#allocation6] sm:$0xff] %vm44_vm0, %v81_v21 }
  0x86   :  { %v58_v25 = vmul.f32 1.442695, %v57_v8 }
  0x89   :  { %v88_v22 = vpop.xlane.xlu2 %87 }
  0x8a   :  { %v89_v24 = vadd.f32 %v88_v22, %v84_v23 }
  0x8b   :  { %v100_v37 = vld [vmem:[#allocation2] sm:$0xff] }
  0x8c   :  { %90 = vst.msk [vmem:[#allocation4] sm:$0xff] %vm44_vm0, %v89_v24  ;;  %v111_v43 = vld [vmem:[#allocation6] sm:$0xff] }
  0x93   :  { %v105_v40 = vld [vmem:[#allocation4] sm:$0xff] }
  0xf6   :  { %v63_v13 = vpop.permute.xlu0 %62 }
  0xf7   :  { %v65_v14 = vsub.f32 %v50_v1, %v63_v13 }
  0xf9   :  { %v66_v15 = vmul.f32 1.442695, %v65_v14 }
  0xfb   :  { %156 = vpow2.f32 %v66_v15 }
  0xfc   :  { %158 = vpow2.f32 %v58_v25 }
 0x101   :  { %v157_v16 = vpop.eup %156 }
 0x102   :  { %v70_v17 = vsel %vm52_vm1, %v157_v16, 0.0  ;;  %v159_v26 = vpop.eup %158 }
 0x103   :  { %71 = vadd.xlane.f32.xlu1 %v70_v17  ;;  %v69_v28 = vmul.f32 %v159_v26, %v68_v27 }
 0x10b   :  { %93 = vadd.xlane.f32.xlu1 %v92_v18 }
 0x176   :  { %v72_v29 = vpop.xlane.xlu1 %71 }
 0x177   :  { %v73_v30 = vadd.f32 %v72_v29, %v69_v28 }
 0x179   :  { %75 = vst.msk [vmem:[#allocation3] sm:$0xff] %vm44_vm0, %v73_v30 }
 0x17e   :  { %v94_v32 = vpop.xlane.xlu1 %93 }
 0x17f   :  { %v95_v33 = vadd.f32 %v94_v32, %v91_v31 }
 0x180   :  { %v101_v34 = vld [vmem:[#allocation3] sm:$0xff] }
 0x181   :  { %96 = vst.msk [vmem:[#allocation5] sm:$0xff] %vm44_vm0, %v95_v33  ;;  %160 = vlog2.f32 %v101_v34 }
 0x187   :  { %v161_v35 = vpop.eup %160 }
 0x188   :  { %v103_v36 = vmul.f32 0.6931472, %v161_v35  ;;  %v106_v38 = vld [vmem:[#allocation5] sm:$0xff] }
 0x18a   :  { %v104_v39 = vadd.f32 %v103_v36, %v100_v37 }
 0x18c   :  { %v107_v41 = vmul.f32 %v106_v38, %v104_v39  ;;  %v110_v42 = vmul.f32 40.0, %v104_v39 }
 0x18e   :  { %v108_v44 = vsub.f32 %v105_v40, %v107_v41  ;;  %v112_v45 = vsub.f32 %v110_v42, %v111_v43 }
 0x190   :  { %v109_v46 = vsub.f32 0.0, %v108_v44  ;;  %v113_v47 = vmul.f32 0.025, %v112_v45 }
 0x192   :  { %v114_v48 = vmul.f32 0.9, %v109_v46  ;;  %v115_v49 = vmul.f32 0.1, %v113_v47 }
 0x194   :  { %v116_v50 = vadd.f32 %v115_v49, %v114_v48 }
 0x196   :  { %v117_v51 = vsel %vm44_vm0, %v116_v50, 0.0 }
 0x197   :  { %118 = vadd.xlane.f32.xlu1 %v117_v51 }
 0x20a   :  { %v119_v52 = vpop.xlane.xlu1 %118 }
 0x20b   :  { %v120_v53 = vrot.slane %v119_v52, 4 }
 0x20d   :  { %v121_v54 = vadd.f32 %v120_v53, %v119_v52 }
 0x20f   :  { %v122_v55 = vrot.slane %v121_v54, 2 }
 0x211   :  { %v123_v56 = vadd.f32 %v122_v55, %v121_v54 }
 0x213   :  { %v124_v57 = vrot.slane %v123_v56, 1 }
 0x215   :  { %v125_v58 = vadd.f32 %v124_v57, %v123_v56 }
 0x217   :  { %147 = vpush %v125_v58 }
 0x248   :  { %s148_s22 = spop %147 }
 0x249   :  { %v127_v59 = vstv %s148_s22 }
 0x24a   :  { %128 = vst [vmem:[#allocation12] sm:$0xff] %v127_v59 }
 0x24b   :  { %139 = dma.vmem_to_hbm [thread:$0]  %s135_s1, 128, %s137_s21, [#allocation9]  }
 0x24c   :  { %238 = dma.done.wait [#allocation9], 128  }
 0x24d   :  { %239 = vsyncadd [#allocation9], 4294967168 }
 0x24e   :  { %144 = vsyncpa [#allocation8], 1 }
 0x24f   :  { %145 = vsyncpa [#allocation11], 1 }
 0x250   :  { %146 = vsyncpa [#allocation9], 1 }

</bundles_post_ra>
